<compile_context>
chip_gen: v7x
topology: tpu7x:2x2x1
jax: 0.10.0
libtpu: 0.0.40
codegen_flags: <defaults>
</compile_context>

<pallas_src>
import jax
import jax.numpy as jnp
from jax.experimental import pallas as pl
from jax.experimental.pallas import tpu as pltpu

C_IN, C_MID = 64, 256   # head: Conv2d(64,256,1) -> BN(256) -> ReLU -> Conv2d(256,1,1)


# ---------------------------------------------------------------------------
# Kernels
# ---------------------------------------------------------------------------
def head_kernel(x_ref, w1t_ref, b1_ref, w2_ref, b2_ref, o_ref):
    # 1x1 conv 64->256 with BatchNorm folded into the weight (bf16 MXU, f32 accum).
    h = jnp.dot(w1t_ref[...], x_ref[...], preferred_element_type=jnp.float32)
    h = jnp.maximum(h + b1_ref[...], 0.0)                       # bias + ReLU (VPU)
    # 1x1 conv 256->1 on the MXU: (1,256) @ (256,tmx). The first matmul only has K=64
    # so the MXU has slack; this removes the VPU sublane-reduce epilogue.
    y = jnp.dot(w2_ref[...], h.astype(w2_ref.dtype),
                preferred_element_type=jnp.float32)              # (1, tmx)
    o_ref[...] = jax.nn.sigmoid(y + b2_ref[0, 0]).astype(o_ref.dtype)


def upsample_kernel(img_ref, r_ref, ct_ref, o_ref):
    # Separable bilinear resize for one image / one Ho-row block:
    #   out(tho, Wo) = R_block(tho,H) @ img(H,W) @ C^T(W,Wo)
    tmp = jnp.dot(r_ref[...], img_ref[0], preferred_element_type=jnp.float32)
    o_ref[0] = jnp.dot(tmp.astype(ct_ref.dtype), ct_ref[...],
                       preferred_element_type=jnp.float32)


# ---------------------------------------------------------------------------
# One-time host precompute (hoisted out of the per-forward path)
# ---------------------------------------------------------------------------
def bilinear_matrix(out_size, in_size):
    # Matches F.interpolate(mode='bilinear', align_corners=False) index mapping.
    # Built with one-hot adds (no scatter HLO).
    dst = jnp.arange(out_size, dtype=jnp.float32)
    src = jnp.maximum((dst + 0.5) * (in_size / out_size) - 0.5, 0.0)
    i0 = jnp.clip(jnp.floor(src).astype(jnp.int32), 0, in_size - 1)
    i1 = jnp.minimum(i0 + 1, in_size - 1)
    w1 = src - i0.astype(jnp.float32)
    w0 = 1.0 - w1
    oh0 = jax.nn.one_hot(i0, in_size, dtype=jnp.float32)
    oh1 = jax.nn.one_hot(i1, in_size, dtype=jnp.float32)
    return oh0 * w0[:, None] + oh1 * w1[:, None]


def fold_head_params(params):
    """Fold conv1 bias + eval-mode BatchNorm into the conv weight and a single bias."""
    eff_scale = params["gamma"] / jnp.sqrt(params["var"] + 1e-5)
    eff_bias = (params["b1"] - params["mean"]) * eff_scale + params["beta"]
    return {
        "w1t": (params["w1"] * eff_scale[None, :]).T.astype(jnp.bfloat16),  # (256,64)
        # (256,1) f32 lane-pads to (256,128) in VMEM; negligible, kept for clarity.
        "b1": eff_bias.reshape(C_MID, 1).astype(jnp.float32),
        "w2": params["w2"].reshape(1, C_MID).astype(jnp.bfloat16),          # (1,256)
        "b2": params["b2"].reshape(1, 1).astype(jnp.float32),               # SMEM scalar
    }


def resize_consts(H, W, Ho, Wo):
    return {
        "r": bilinear_matrix(Ho, H).astype(jnp.bfloat16),       # (Ho, H)
        "ct": bilinear_matrix(Wo, W).T.astype(jnp.bfloat16),    # (W, Wo), shared by all N
    }


# ---------------------------------------------------------------------------
# Tiling helpers
# ---------------------------------------------------------------------------
def _pick_pixel_tile(p, max_tile=4096):
    """Largest lane tile (multiple of 128, <= max_tile) dividing p that keeps >=2
    grid steps (so both v7x TensorCores get work)."""
    best = None
    for t in range(128, min(max_tile, p) + 1, 128):
        if p % t == 0 and p // t >= 2:
            best = t
    if best is None:          # p == 128 (or no >=2-step divisor): single step
        best = min(p, max_tile)
        while p % best != 0 or best % 128 != 0:
            best -= 128
    return best


def _pick_row_tile(ho, max_rows=256):
    """Ho-row block for the upsample: multiple of 8 dividing Ho, >=2 blocks if possible."""
    best = None
    for t in range(8, min(max_rows, ho) + 1, 8):
        if ho % t == 0 and ho // t >= 2:
            best = t
    return best if best is not None else ho


# ---------------------------------------------------------------------------
# Forward builder
# ---------------------------------------------------------------------------
def make_csnet_eval_fn(feat_shape, img_hw):
    """Builds the jitted eval forward: pred = uphw(sigmoid(head(f1)), size=img_hw)."""
    N, Cin, H, W = feat_shape
    Ho, Wo = img_hw
    assert Cin == C_IN
    P = N * H * W
    assert P % 128 == 0   # TODO(synk): pad / mask tail tile for arbitrary sizes
    tmx = _pick_pixel_tile(P)
    tho = _pick_row_tile(Ho)

    head_call = pl.pallas_call(
        head_kernel,
        out_shape=jax.ShapeDtypeStruct((1, P), jnp.bfloat16),
        grid_spec=pltpu.PrefetchScalarGridSpec(
            num_scalar_prefetch=0,
            grid=(P // tmx,),
            in_specs=[
                pl.BlockSpec((C_IN, tmx), lambda i: (0, i)),        # pixel slab
                pl.BlockSpec((C_MID, C_IN), lambda i: (0, 0)),      # folded w1^T
                pl.BlockSpec((C_MID, 1), lambda i: (0, 0)),         # folded bias
                pl.BlockSpec((1, C_MID), lambda i: (0, 0)),         # w2 row (MXU)
                pl.BlockSpec(memory_space=pltpu.MemorySpace.SMEM),  # b2 scalar
            ],
            out_specs=pl.BlockSpec((1, tmx), lambda i: (0, i)),     # lane-dense blocks
        ),
        compiler_params=pltpu.CompilerParams(
            dimension_semantics=("parallel",),
            # v5e's scoped-VMEM default is 16 MiB; raise it once the f32 intermediate
            # (256 x tmx) plus double-buffered slabs get large.
            vmem_limit_bytes=(64 * 1024 * 1024 if tmx >= 2048 else None),
        ),
    )

    up_call = pl.pallas_call(
        upsample_kernel,
        out_shape=jax.ShapeDtypeStruct((N, Ho, Wo), jnp.float32),
        grid_spec=pltpu.PrefetchScalarGridSpec(
            num_scalar_prefetch=0,
            grid=(N, Ho // tho),                                    # per image x row-block
            in_specs=[
                pl.BlockSpec((1, H, W), lambda n, j: (n, 0, 0)),    # one small image
                pl.BlockSpec((tho, H), lambda n, j: (j, 0)),        # row-interp block
                pl.BlockSpec((W, Wo), lambda n, j: (0, 0)),         # shared C^T tile
            ],
            out_specs=pl.BlockSpec((1, tho, Wo), lambda n, j: (n, j, 0)),
        ),
        compiler_params=pltpu.CompilerParams(
            dimension_semantics=("parallel", "parallel"),
        ),
    )

    @jax.jit
    def forward(f1, consts):
        # Channels-first pixel slab with (n, h, w) pixel order so the head output
        # reshapes straight into the per-image (N, H, W) stack the upsample reads.
        x_cf = jnp.transpose(f1, (1, 0, 2, 3)).reshape(C_IN, P).astype(jnp.bfloat16)
        sig_flat = head_call(x_cf, consts["w1t"], consts["b1"],
                             consts["w2"], consts["b2"])
        img = sig_flat.reshape(N, H, W)           # tiny (~P bytes) intermediate
        pred = up_call(img, consts["r"], consts["ct"])   # (N, Ho, Wo) f32
        return {"pred": pred[:, None, :, :]}

    return forward


# ---------------------------------------------------------------------------
# Pure-JAX reference (mirrors the kernels' bf16 quantization points)
# ---------------------------------------------------------------------------
def _reference_forward(x, f1, params):
    N, Cin, H, W = f1.shape
    Ho, Wo = x.shape[2], x.shape[3]
    eff_scale = params["gamma"] / jnp.sqrt(params["var"] + 1e-5)
    eff_bias = (params["b1"] - params["mean"]) * eff_scale + params["beta"]
    w1f = (params["w1"] * eff_scale[None, :]).astype(jnp.bfloat16)        # (64, 256)
    xf = jnp.transpose(f1, (0, 2, 3, 1)).reshape(-1, Cin).astype(jnp.bfloat16)
    h = jnp.dot(xf.astype(jnp.float32), w1f.astype(jnp.float32)) + eff_bias[None, :]
    h = jnp.maximum(h, 0.0).astype(jnp.bfloat16)
    w2 = params["w2"].astype(jnp.bfloat16)
    y = jnp.dot(h.astype(jnp.float32), w2.astype(jnp.float32)) + params["b2"]
    sig = jax.nn.sigmoid(y).astype(jnp.bfloat16).reshape(N, H, W)
    r = bilinear_matrix(Ho, H).astype(jnp.bfloat16)
    ct = bilinear_matrix(Wo, W).T.astype(jnp.bfloat16)                    # (W, Wo)
    tmp = jnp.einsum("oh,nhw->now", r.astype(jnp.float32), sig.astype(jnp.float32))
    tmp = tmp.astype(jnp.bfloat16)
    out = jnp.einsum("now,wk->nok", tmp.astype(jnp.float32), ct.astype(jnp.float32))
    return out.reshape(N, 1, Ho, Wo)


if __name__ == "__main__":
    key = jax.random.PRNGKey(0)
    ks = jax.random.split(key, 6)

    N, H, W = 2, 16, 16      # decoder f1 feature spatial size
    Ho, Wo = 64, 64          # input image spatial size (upsample target)

    x = jax.random.normal(ks[0], (N, 3, Ho, Wo), jnp.float32)       # image (NCHW)
    f1 = jax.random.normal(ks[1], (N, C_IN, H, W), jnp.float32)     # decoder feature

    params = {
        # Conv2d(64,256,1): weight stored as (in, out) matmul form, plus bias.
        "w1": 0.1 * jax.random.normal(ks[2], (C_IN, C_MID), jnp.float32),
        "b1": 0.1 * jax.random.normal(ks[3], (C_MID,), jnp.float32),
        # BatchNorm2d(256) eval-mode parameters / running stats.
        "gamma": jnp.ones((C_MID,), jnp.float32),
        "beta": jnp.zeros((C_MID,), jnp.float32),
        "mean": jnp.zeros((C_MID,), jnp.float32),
        "var": jnp.ones((C_MID,), jnp.float32),
        # Conv2d(256,1,1)
        "w2": 0.1 * jax.random.normal(ks[4], (C_MID, 1), jnp.float32),
        "b2": 0.05 * jax.random.normal(ks[5], (1,), jnp.float32),
    }

    # One-time precompute (BN folding, weight casts, bilinear matrices) — not re-run
    # per forward.
    consts = {**fold_head_params(params), **resize_consts(H, W, Ho, Wo)}
    forward = make_csnet_eval_fn(f1.shape, (Ho, Wo))

    out = forward(f1, consts)
    pred = jax.block_until_ready(out["pred"])
    assert pred.shape == (N, 1, Ho, Wo)
    assert bool(jnp.all(jnp.isfinite(pred)))

    # Numerical check vs a pure-JAX reference with matching bf16 quantization.
    ref = _reference_forward(x, f1, params)
    assert bool(jnp.max(jnp.abs(pred - ref)) < 3e-2)

    print("KERNEL_OK")
</pallas_src>

<mosaic_0001>
module attributes {stable_mosaic.version = 11 : i64} {
  func.func @upsample_kernel(%arg0: i32, %arg1: i32, %arg2: memref<1x16x16xbf16, #tpu.memory_space<vmem>>, %arg3: memref<32x16xbf16, #tpu.memory_space<vmem>>, %arg4: memref<16x64xbf16, #tpu.memory_space<vmem>>, %arg5: memref<1x32x64xf32, #tpu.memory_space<vmem>>) attributes {dimension_semantics = [#tpu.dimension_semantics<parallel>, #tpu.dimension_semantics<parallel>], iteration_bounds = array<i64: 2, 2>, scalar_prefetch = 0 : i64, scratch_operands = 0 : i64, tpu.core_type = #tpu.core_type<tc>, window_params = [{transform_indices = @transform_0, window_bounds = array<i64: 1, 16, 16>}, {transform_indices = @transform_1, window_bounds = array<i64: 32, 16>}, {pipeline_mode = #tpu.pipeline_mode<synchronous>, transform_indices = @transform_2, window_bounds = array<i64: 16, 64>}, {transform_indices = @transform_3, window_bounds = array<i64: 1, 32, 64>}]} {
    %c0 = arith.constant 0 : index
    %c0_0 = arith.constant 0 : index
    %0 = vector.load %arg3[%c0, %c0_0] : memref<32x16xbf16, #tpu.memory_space<vmem>>, vector<32x16xbf16>
    %c0_1 = arith.constant 0 : index
    %c0_2 = arith.constant 0 : index
    %c0_3 = arith.constant 0 : index
    %1 = vector.load %arg2[%c0_1, %c0_2, %c0_3] : memref<1x16x16xbf16, #tpu.memory_space<vmem>>, vector<1x16x16xbf16>
    %2 = vector.shape_cast %1 : vector<1x16x16xbf16> to vector<16x16xbf16>
    %cst = arith.constant dense<0.000000e+00> : vector<32x16xf32>
    %3 = tpu.matmul %0, %2, %cst {dimension_numbers = #tpu.dot_dimension_numbers<[1], [0], [0], [1], [0, 0, 1, 1], [], []>} : vector<32x16xbf16>, vector<16x16xbf16>, vector<32x16xf32> -> vector<32x16xf32>
    %4 = arith.truncf %3 : vector<32x16xf32> to vector<32x16xbf16>
    %c0_4 = arith.constant 0 : index
    %c0_5 = arith.constant 0 : index
    %5 = vector.load %arg4[%c0_4, %c0_5] : memref<16x64xbf16, #tpu.memory_space<vmem>>, vector<16x64xbf16>
    %cst_6 = arith.constant dense<0.000000e+00> : vector<32x64xf32>
    %6 = tpu.matmul %4, %5, %cst_6 {dimension_numbers = #tpu.dot_dimension_numbers<[1], [0], [0], [1], [0, 0, 1, 1], [], []>} : vector<32x16xbf16>, vector<16x64xbf16>, vector<32x64xf32> -> vector<32x64xf32>
    %c0_7 = arith.constant 0 : index
    %c0_8 = arith.constant 0 : index
    %c0_9 = arith.constant 0 : index
    %7 = vector.load %arg5[%c0_7, %c0_8, %c0_9] : memref<1x32x64xf32, #tpu.memory_space<vmem>>, vector<1x32x64xf32>
    %8 = vector.shape_cast %7 : vector<1x32x64xf32> to vector<32x64xf32>
    %9 = vector.shape_cast %6 : vector<32x64xf32> to vector<1x32x64xf32>
    tpu.vector_store %arg5[%c0_7, %c0_8, %c0_9], %9 {strides = array<i32>} : memref<1x32x64xf32, #tpu.memory_space<vmem>>, vector<1x32x64xf32>,
    return
  }
  func.func @transform_0(%arg0: i32, %arg1: i32) -> (i32, i32, i32) {
    %c0_i32 = arith.constant 0 : i32
    %c0_i32_0 = arith.constant 0 : i32
    %c0_i32_1 = arith.constant 0 : i32
    return %arg0, %c0_i32, %c0_i32_0 : i32, i32, i32
  }
  func.func @transform_1(%arg0: i32, %arg1: i32) -> (i32, i32) {
    %c0_i32 = arith.constant 0 : i32
    %c0_i32_0 = arith.constant 0 : i32
    return %arg1, %c0_i32 : i32, i32
  }
  func.func @transform_2(%arg0: i32, %arg1: i32) -> (i32, i32) {
    %c0_i32 = arith.constant 0 : i32
    %c0_i32_0 = arith.constant 0 : i32
    %c0_i32_1 = arith.constant 0 : i32
    return %c0_i32, %c0_i32_0 : i32, i32
  }
  func.func @transform_3(%arg0: i32, %arg1: i32) -> (i32, i32, i32) {
    %c0_i32 = arith.constant 0 : i32
    %c0_i32_0 = arith.constant 0 : i32
    return %arg0, %arg1, %c0_i32 : i32, i32, i32
  }
}

module attributes {stable_mosaic.version = 11 : i64} {
  func.func @head_kernel(%arg0: i32, %arg1: memref<64x256xbf16, #tpu.memory_space<vmem>>, %arg2: memref<256x64xbf16, #tpu.memory_space<vmem>>, %arg3: memref<256x1xf32, #tpu.memory_space<vmem>>, %arg4: memref<1x256xbf16, #tpu.memory_space<vmem>>, %arg5: memref<1x1xf32, #tpu.memory_space<smem>>, %arg6: memref<1x256xbf16, #tpu.memory_space<vmem>>) attributes {dimension_semantics = [#tpu.dimension_semantics<parallel>], iteration_bounds = array<i64: 2>, scalar_prefetch = 0 : i64, scratch_operands = 0 : i64, tpu.core_type = #tpu.core_type<tc>, window_params = [{transform_indices = @transform_0, window_bounds = array<i64: 64, 256>}, {pipeline_mode = #tpu.pipeline_mode<synchronous>, transform_indices = @transform_1, window_bounds = array<i64: 256, 64>}, {pipeline_mode = #tpu.pipeline_mode<synchronous>, transform_indices = @transform_2, window_bounds = array<i64: 256, 1>}, {pipeline_mode = #tpu.pipeline_mode<synchronous>, transform_indices = @transform_3, window_bounds = array<i64: 1, 256>}, {transform_indices = @transform_4, window_bounds = array<i64: 1, 1>}, {transform_indices = @transform_5, window_bounds = array<i64: 1, 256>}]} {
    %c0 = arith.constant 0 : index
    %c0_0 = arith.constant 0 : index
    %0 = vector.load %arg2[%c0, %c0_0] : memref<256x64xbf16, #tpu.memory_space<vmem>>, vector<256x64xbf16>
    %c0_1 = arith.constant 0 : index
    %c0_2 = arith.constant 0 : index
    %1 = vector.load %arg1[%c0_1, %c0_2] : memref<64x256xbf16, #tpu.memory_space<vmem>>, vector<64x256xbf16>
    %cst = arith.constant dense<0.000000e+00> : vector<256x256xf32>
    %2 = tpu.matmul %0, %1, %cst {dimension_numbers = #tpu.dot_dimension_numbers<[1], [0], [0], [1], [0, 0, 1, 1], [], []>} : vector<256x64xbf16>, vector<64x256xbf16>, vector<256x256xf32> -> vector<256x256xf32>
    %c0_3 = arith.constant 0 : index
    %c0_4 = arith.constant 0 : index
    %3 = vector.load %arg3[%c0_3, %c0_4] : memref<256x1xf32, #tpu.memory_space<vmem>>, vector<256x1xf32>
    %4 = vector.broadcast %3 : vector<256x1xf32> to vector<256x256xf32>
    %5 = arith.addf %2, %4 : vector<256x256xf32>
    %cst_5 = arith.constant 0.000000e+00 : f32
    %6 = vector.broadcast %cst_5 : f32 to vector<256x256xf32>
    %7 = arith.maximumf %5, %6 : vector<256x256xf32>
    %c0_6 = arith.constant 0 : index
    %c0_7 = arith.constant 0 : index
    %8 = vector.load %arg4[%c0_6, %c0_7] : memref<1x256xbf16, #tpu.memory_space<vmem>>, vector<1x256xbf16>
    %9 = arith.truncf %7 : vector<256x256xf32> to vector<256x256xbf16>
    %cst_8 = arith.constant dense<0.000000e+00> : vector<1x256xf32>
    %10 = tpu.matmul %8, %9, %cst_8 {dimension_numbers = #tpu.dot_dimension_numbers<[1], [0], [0], [1], [0, 0, 1, 1], [], []>} : vector<1x256xbf16>, vector<256x256xbf16>, vector<1x256xf32> -> vector<1x256xf32>
    %c0_9 = arith.constant 0 : index
    %c0_10 = arith.constant 0 : index
    %11 = memref.load %arg5[%c0_9, %c0_10] : memref<1x1xf32, #tpu.memory_space<smem>>
    %12 = vector.broadcast %11 : f32 to vector<1x256xf32>
    %13 = arith.addf %10, %12 : vector<1x256xf32>
    %14 = arith.negf %13 : vector<1x256xf32>
    %15 = math.exp %14 : vector<1x256xf32>
    %cst_11 = arith.constant 1.000000e+00 : f32
    %16 = vector.broadcast %cst_11 : f32 to vector<1x256xf32>
    %17 = arith.addf %16, %15 : vector<1x256xf32>
    %18 = arith.divf %16, %17 : vector<1x256xf32>
    %19 = arith.truncf %18 : vector<1x256xf32> to vector<1x256xbf16>
    %c0_12 = arith.constant 0 : index
    %c0_13 = arith.constant 0 : index
    %20 = vector.load %arg6[%c0_12, %c0_13] : memref<1x256xbf16, #tpu.memory_space<vmem>>, vector<1x256xbf16>
    tpu.vector_store %arg6[%c0_12, %c0_13], %19 {strides = array<i32>} : memref<1x256xbf16, #tpu.memory_space<vmem>>, vector<1x256xbf16>,
    return
  }
  func.func @transform_0(%arg0: i32) -> (i32, i32) {
    %c0_i32 = arith.constant 0 : i32
    %c0_i32_0 = arith.constant 0 : i32
    return %c0_i32, %arg0 : i32, i32
  }
  func.func @transform_1(%arg0: i32) -> (i32, i32) {
    %c0_i32 = arith.constant 0 : i32
    %c0_i32_0 = arith.constant 0 : i32
    %c0_i32_1 = arith.constant 0 : i32
    return %c0_i32, %c0_i32_0 : i32, i32
  }
  func.func @transform_2(%arg0: i32) -> (i32, i32) {
    %c0_i32 = arith.constant 0 : i32
    %c0_i32_0 = arith.constant 0 : i32
    %c0_i32_1 = arith.constant 0 : i32
    return %c0_i32, %c0_i32_0 : i32, i32
  }
  func.func @transform_3(%arg0: i32) -> (i32, i32) {
    %c0_i32 = arith.constant 0 : i32
    %c0_i32_0 = arith.constant 0 : i32
    %c0_i32_1 = arith.constant 0 : i32
    return %c0_i32, %c0_i32_0 : i32, i32
  }
  func.func @transform_4(%arg0: i32) -> (i32, i32) {
    %c0_i32 = arith.constant 0 : i32
    %c0_i32_0 = arith.constant 0 : i32
    %c0_i32_1 = arith.constant 0 : i32
    return %c0_i32, %c0_i32_0 : i32, i32
  }
  func.func @transform_5(%arg0: i32) -> (i32, i32) {
    %c0_i32 = arith.constant 0 : i32
    %c0_i32_0 = arith.constant 0 : i32
    return %c0_i32, %arg0 : i32, i32
  }
}

</mosaic_0001>

<bundles_post_ra>
// kernel: forward.3
= control target key start
LH: loop header
LB: loop body
LE: loop exit
PB: predicated region body
PF: predicated region fallthrough
CT: control target
= control target key end

     0   :  { %8 = vsyncpa [#allocation3], 0  ;;  %s851_s0 = inlined_call_operand.vmem [shape: bf16[2,16,16], index: 0, kind: input, shape index: {}]   ;;  %s852_s1 = inlined_call_operand.vmem [shape: bf16[64,16], index: 1, kind: input, shape index: {}]   ;;  %s853_s2 = inlined_call_operand.vmem [shape: bf16[16,64], index: 2, kind: input, shape index: {}]   ;;  %s854_s3 = inlined_call_operand.hbm [shape: f32[2,64,64], index: 3, kind: output, shape index: {}]  }
   0x1   :  { %10 = vsyncpa [#allocation3 + $0x1], 0  ;;  %s698_s12 = smov 0   ;;  %s700_s13 = smov 0  }
   0x2   :  { %s702_s14 = smov 0   ;;  %s704_s15 = smov 0  }
   0x3   :  { %s706_s16 = smov 0   ;;  %s708_s17 = smov 0  }
   0x4   :  { %s710_s18 = smov 0   ;;  %s712_s19 = smov 0  }
   0x5 LB: > { %s459_s20 = sadd.s32 4294967295, %s673_s19   ;;  %s460_s21 = sadd.s32 4294967294, %s673_s19   ;;  %s673_s19 = sphi %s712_s19, %s16_s19   ;;  %s669_s18 = sphi %s710_s18, %s863_s18   ;;  %s665_s17 = sphi %s708_s17, %s862_s17   ;;  %s661_s16 = sphi %s706_s16, %s861_s16   ;;  %s657_s15 = sphi %s704_s15, %s860_s15   ;;  %s653_s14 = sphi %s702_s14, %s859_s14   ;;  %s649_s13 = sphi %s700_s13, %s858_s13   ;;  %s645_s12 = sphi %s698_s12, %s857_s12  }
   0x6   : > { %s25_s22 = sadd.s32 1, %s665_s17  ;;  %s28_s23 = sadd.s32 1, %s669_s18 }
   0x7   : > { %p26_p0 = scmp.ge.s32.totalorder %s25_s22, 2  ;;  %p120_p1 = scmp.ne.s32.totalorder %s653_s14, %s649_s13 }
   0x8   : > { %p121_p2 = scmp.eq.s32.totalorder %s459_s20, 3  ;;  %p126_p5 = scmp.ne.s32.totalorder %s649_s13, %s645_s12 }
   0x9   : > { %s865_s22 = smov (%p26_p0, %s25_s22), 0  ;;  %s867_s23 = smov (!%p26_p0, %s28_s23), %s669_s18 }
   0xa   : > { %s106_s24 = ssub.s32 %s665_s17, %s865_s22  ;;  %p749_p3 = por %p121_p2, %p120_p1 }
   0xb   : > { %p30_p4 = scmp.ge.s32.totalorder %s867_s23, 2  ;;  %p127_p6 = scmp.eq.s32.totalorder %s460_s21, 3 }
   0xc   : > { %p463_p7 = scmp.ge.s32.totalorder %s673_s19, 1  ;;  %p165_p9 = scmp.lt.s32.totalorder %s673_s19, 5 }
   0xd   : > { %s869_s23 = smov (%p30_p4, %s867_s23), 0  ;;  %p758_p8 = por %p127_p6, %p126_p5 }
   0xe   : > { %s105_s27 = ssub.s32 %s669_s18, %s869_s23  ;;  %s110_s28 = sadd.s32 1, %s653_s14 }
   0xf   : > { %s107_s29 = sor.u32 %s106_s24, %s105_s27  ;;  %p166_p10 = pnand %p463_p7, %p165_p9 }
  0x10   : > { %p108_p11 = scmp.eq.s32.totalorder %s107_s29, 0  ;;  %p194_p12 = scmp.lt.s32.totalorder (!%p166_p10), %s661_s16, 1  ;;  %vm229_vm0 = vcmask (!%p166_p10), 130048   ;;  %v578_v3 = vld [vmem:[%s853_s2] sm:$0xff] (!%p166_p10)   ;;  %vm350_vm1 = vcmask (!%p166_p10), 523264  }
  0x11   : > { %169 = sbr.rel (%p166_p10) target bundleno = 481 (0x1e1), region = 32  ;;  %s771_s4 = sshll.u32 (!%p166_p10), %s657_s15, 2  ;;  %496 = vmatprep.subr.bf16.mxu1 (!%p166_p10), %v578_v3 }
  0x12   : > { %s767_s30 = scalar_select %p108_p11, %s653_s14, %s110_s28  }
  0x13   : > { %p200_p13 = scmp.lt.s32.totalorder (!%p166_p10), %s771_s4, 7  ;;  %497 = vmatpush3.bf16.msra.mxu1 (!%p166_p10), %v578_v3  ;;  %s479_s28 = sshll.u32 (!%p166_p10), %s661_s16, 3 }
  0x14   : > { %s191_s29 = sand.u32 (!%p166_p10), 1, %s649_s13   ;;  %s675_s21 = smov (!%p166_p10), [#allocation2]  }
  0x18   : > { %s195_s5 = scalar_select %p194_p12, %s661_s16, 1 }
  0x19   : > { %s201_s6 = scalar_select %p200_p13, %s771_s4, 7 }
  0x1a   : > { %s483_s7 = sshll.u32 %s195_s5, 3  ;;  %s368_s5 = sadd.s32 %s479_s28, %s771_s4 }
  0x1b   : > { %s198_s10 = scalar_lea.vmem %s851_s0, %s483_s7  ;;  %s468_s11 = sshll.u32 %s201_s6, 2 }
  0x1c   : > { %v575_v0 = vld [vmem:[%s198_s10] sm:$0xff]   ;;  %s203_s24 = scalar_lea.vmem %s852_s1, %s468_s11  ;;  %s464_s6 = sshll.u32 %s191_s29, 5 }
  0x1d   : > { %v576_v1 = vld [vmem:[%s203_s24] sm:$0xff]   ;;  %490 = vmatprep.subr.bf16.mxu0 %v575_v0  ;;  %v577_v2 = vld [vmem:[%s203_s24 + $0x8] sm:$0xff]   ;;  %s480_s7 = sshll.u32 %s368_s5, 7  ;;  %s193_s8 = scalar_lea.vmem [#allocation2], %s464_s6 }
  0x1e   : > { %491 = vmatpush3.bf16.msra.mxu0 %v575_v0  ;;  %492 = vmatprep.mubr.msk.bf16.mxu0 %vm229_vm0, %v576_v1  ;;  %s371_s9 = sshll.u32 %s193_s8, 4  ;;  %s795_s20 = scalar_lea.hbm %s854_s3, %s480_s7  ;;  %s797_s9 = int_to_ptr.vmem [resolvable:$true] %s371_s9 }
  0x1f   : > { %s799_s16 = scalar_lea.sflag [#allocation3], %s191_s29  ;;  %s579_s4 = scalar_lea.vmem %s797_s9, 512 }
  0x20   : > { %p580_p0 = scmp.ne.s32.totalorder %s797_s9, %s579_s4  ;;  %s583_s24 = sshll.u32 %s675_s21, 4  ;;  %s584_s24 = int_to_ptr.vmem [resolvable:$false] %s583_s24 }
  0x21   : > { %493 = vmatmul.mubr.msk.bf16.vlgmr.msra.gmra.mrb[0].mxu0 %vm229_vm0, %v577_v2  ;;  %s585_s15 = scalar_lea.vmem %s584_s24, 1024  ;;  %p586_p4 = scmp.lt.s32.totalorder %s797_s9, %s584_s24 }
  0x22   : > { %p581_p1 = pnand %p580_p0, %p749_p3  ;;  %p587_p5 = scmp.lt.s32.totalorder %s585_s15, %s579_s4 }
  0x24   : > { %p582_p2 = pneg %p581_p1  ;;  %p588_p6 = por %p587_p5, %p586_p4 }
  0x26   : > { %p589_p7 = pnand %p588_p6, %p582_p2 }
  0xf4   : > { %v494_v4 = vpop.f32.mrb[0].mxu0 }
  0xf5   : > { %v270_v5 = vpop.f32.mrb[1].mxu0 }
  0xf6   : > { %v495_v6 = vpop.f32.mrb[2].mxu0 }
  0xf7   : > { %v286_v7 = vpack.c.bf16 %v495_v6, %v494_v4  ;;  %v273_v8 = vpop.f32.mrb[3].mxu0 }
  0xf8   : > { %v285_v9 = vpack.c.bf16 %v273_v8, %v270_v5 }
  0xfa   : > { %498 = vmatprep.mubr.msk.bf16.mxu1 %vm229_vm0, %v285_v9 }
  0xfb   : > { %499 = vmatmul.mubr.msk.bf16.vlgmr.msra.gmra.mrb[0].mxu1 %vm229_vm0, %v286_v7 }
 0x1ce   : > { %v500_v10 = vpop.f32.mrb[0].mxu1 }
 0x1cf   : > { %353 = vst.msk [vmem:[%s193_s8 + $0x10] sm:$0xff] %vm350_vm1, %v500_v10  ;;  %v335_v11 = vpop.f32.mrb[1].mxu1 }
 0x1d0   : > { %351 = vst.msk [vmem:[%s193_s8] sm:$0xff] %vm350_vm1, %v335_v11  ;;  %v501_v12 = vpop.f32.mrb[2].mxu1 }
 0x1d1   : > { %354 = vst.msk [vmem:[%s193_s8 + $0x18] sm:$0xff] %vm350_vm1, %v501_v12  ;;  %v338_v13 = vpop.f32.mrb[3].mxu1 }
 0x1d2   : > { %352 = vst.msk [vmem:[%s193_s8 + $0x8] sm:$0xff] %vm350_vm1, %v338_v13 }
 0x1d3   : > { %592 = shalt.err (!%p589_p7)
}
 0x1d4   : > { %s593_s27 = scalar_lea.hbm %s795_s20, 512  ;;  %s597_s5 = scalar_lea.hbm %s854_s3, 2048 }
 0x1d5   : > { %p594_p9 = scmp.ne.s32.totalorder %s795_s20, %s593_s27  ;;  %p598_p12 = scmp.lt.u32.totalorder %s795_s20, %s854_s3 }
 0x1d6   : > { %p599_p13 = scmp.lt.u32.totalorder %s597_s5, %s593_s27  ;;  %p601_p1 = scmp.lt.u32.totalorder %s593_s27, %s795_s20 }
 0x1d7   : > { %p595_p10 = pnand %p594_p9, %p749_p3 }
 0x1d8   : > { %p600_p0 = por %p599_p13, %p598_p12 }
 0x1d9   : > { %p596_p11 = pneg %p595_p10 }
 0x1da   : > { %p602_p2 = por %p601_p1, %p600_p0 }
 0x1dc   : > { %p603_p4 = pnand %p602_p2, %p596_p11 }
 0x1de   : > { %606 = shalt.err (!%p603_p4)
}
 0x1df   : > { %s676_s8 = smov 128   ;;  %s677_s10 = smov 8  }
 0x1e0   : > { %502 = dma.vmem_to_hbm [thread:$0]  (%p749_p3), %s797_s9, 512, %s795_s20, %s799_s16, %s676_s8, %s676_s8, %s677_s10  }
 0x1e1 PF: > { %p508_p5 = scmp.ge.s32.totalorder %s673_s19, 2  ;;  %s386_s11 = sand.u32 1, %s645_s12  }
 0x1e2   : > { %s387_s4 = scalar_lea.sflag [#allocation3], %s386_s11 }
 0x1e3   : > { %p505_p6 = pnand %p508_p5, %p758_p8 }
 0x1e5   : > { %640 = dma.done.wait (!%p505_p6), %s387_s4, 512  }
 0x1e6   : > { %642 = vsyncadd (!%p505_p6), %s387_s4, 4294966784  ;;  %s16_s19 = sadd.s32 1, %s673_s19   ;;  %s857_s12 = smov %s649_s13 }
 0x1e7   : > { %p13_p7 = scmp.ge.s32.totalorder %s16_s19, 6   ;;  %s858_s13 = smov %s653_s14 }
 0x1e8   : > { %s859_s14 = smov %s767_s30  ;;  %s860_s15 = smov %s665_s17 }
 0x1e9   : > { %s861_s16 = smov %s669_s18  ;;  %s862_s17 = smov %s865_s22 }
 0x1ea   : > { %s863_s18 = smov %s869_s23  ;;  %15 = sbr.rel (!%p13_p7) target bundleno = 5 (0x5), region = 70 }
 0x1f1   :  { %392 = vsyncpa [#allocation3], 1 }
 0x1f2   :  { %394 = vsyncpa [#allocation3 + $0x1], 1 }

// kernel: forward.2
= control target key start
LH: loop header
LB: loop body
LE: loop exit
PB: predicated region body
PF: predicated region fallthrough
CT: control target
= control target key end

     0   :  { %s1571_s0 = inlined_call_operand.vmem [shape: bf16[64,512], index: 0, kind: input, shape index: {}]   ;;  %s1572_s1 = inlined_call_operand.vmem [shape: bf16[256,64], index: 1, kind: input, shape index: {}]   ;;  %s1573_s2 = inlined_call_operand.vmem [shape: f32[256,1], index: 2, kind: input, shape index: {}]   ;;  %s1574_s3 = inlined_call_operand.vmem [shape: bf16[1,256], index: 3, kind: input, shape index: {}]   ;;  %s1575_s4 = inlined_call_operand.<no memory space> [shape: f32[1,1], index: 4, kind: input, shape index: {}]   ;;  %s1576_s5 = inlined_call_operand.vmem [shape: bf16[1,512], index: 5, kind: output, shape index: {}]  }
   0x1   :  { %10 = sst [smem:[#allocation2]] %s1575_s4 }
   0x2   :  { %s1327_s20 = smov 0   ;;  %s1329_s21 = smov 0  }
   0x3   :  { %s1331_s22 = smov 0  }
   0x4 LB: > { %s1147_s4 = sadd.s32 4294967295, %s1290_s22   ;;  %s1344_s23 = sadd.s32 1, %s1290_s22   ;;  %s1290_s22 = sphi %s1331_s22, %s1579_s22   ;;  %s1286_s21 = sphi %s1329_s21, %s1578_s21   ;;  %s1282_s20 = sphi %s1327_s20, %s1577_s20  }
   0x5   : > { %s20_s24 = ssub.s32 %s1290_s22, %s1344_s23  ;;  %s23_s25 = sadd.s32 1, %s1286_s21 }
   0x6   : > { %p21_p0 = scmp.eq.s32.totalorder %s20_s24, 0  ;;  %p30_p1 = scmp.ne.s32.totalorder %s1286_s21, %s1282_s20 }
   0x7   : > { %p31_p2 = scmp.eq.s32.totalorder %s1290_s22, 0  ;;  %p1150_p4 = scmp.ge.s32.totalorder %s1290_s22, 2 }
   0x8   : > { %s1353_s26 = scalar_select %p21_p0, %s1286_s21, %s23_s25  }
   0x9   : > { %p32_p3 = por %p31_p2, %p30_p1  ;;  %178 = sbr.rel (%p1150_p4) target bundleno = 24 (0x18), region = 32 }
  0x10   : > { %181 = sbr.rel (!%p32_p3) target bundleno = 24 (0x18), region = 36  ;;  %s183_s27 = sand.u32 (%p32_p3), 1, %s1286_s21  }
  0x11   : > { %s1203_s28 = sshll.u32 (%p32_p3), %s1290_s22, 3  ;;  %s1151_s29 = sshll.u32 (%p32_p3), %s183_s27, 6 }
  0x12   : > { %s188_s7 = scalar_lea.vmem (%p32_p3), %s1571_s0, %s1203_s28  ;;  %s185_s8 = scalar_lea.vmem (%p32_p3), [#allocation3], %s1151_s29 }
  0x13   : > { %v230_v0 = vld [vmem:[%s188_s7] sm:$0xff] (%p32_p3)  ;;  %v232_v1 = vld [vmem:[%s188_s7 + $0x10] sm:$0xff] (%p32_p3) }
  0x14   : > { %v234_v2 = vld [vmem:[%s188_s7 + $0x20] sm:$0xff] (%p32_p3)  ;;  %231 = vst [vmem:[%s185_s8] sm:$0xff] (%p32_p3), %v230_v0  ;;  %233 = vst [vmem:[%s185_s8 + $0x8] sm:$0xff] (%p32_p3), %v232_v1  ;;  %v236_v3 = vld [vmem:[%s188_s7 + $0x30] sm:$0xff] (%p32_p3) }
  0x15   : > { %235 = vst [vmem:[%s185_s8 + $0x10] sm:$0xff] (%p32_p3), %v234_v2  ;;  %v238_v4 = vld [vmem:[%s188_s7 + $0x40] sm:$0xff] (%p32_p3)  ;;  %v240_v5 = vld [vmem:[%s188_s7 + $0x50] sm:$0xff] (%p32_p3)  ;;  %237 = vst [vmem:[%s185_s8 + $0x18] sm:$0xff] (%p32_p3), %v236_v3 }
  0x16   : > { %239 = vst [vmem:[%s185_s8 + $0x20] sm:$0xff] (%p32_p3), %v238_v4  ;;  %241 = vst [vmem:[%s185_s8 + $0x28] sm:$0xff] (%p32_p3), %v240_v5  ;;  %v242_v6 = vld [vmem:[%s188_s7 + $0x60] sm:$0xff] (%p32_p3)  ;;  %v244_v7 = vld [vmem:[%s188_s7 + $0x70] sm:$0xff] (%p32_p3) }
  0x17   : > { %243 = vst [vmem:[%s185_s8 + $0x30] sm:$0xff] %v242_v6  ;;  %245 = vst [vmem:[%s185_s8 + $0x38] sm:$0xff] %v244_v7 }
  0x18 PF: > { %p1154_p5 = scmp.ge.s32.totalorder %s1290_s22, 1  ;;  %p250_p6 = scmp.lt.s32.totalorder %s1290_s22, 3 }
  0x1a   : > { %p251_p7 = pnand %p1154_p5, %p250_p6 }
  0x1b   : > { %s257_s9 = sand.u32 (!%p251_p7), 1, %s1282_s20   ;;  %v1292_v8 = vmov (!%p251_p7), 0   ;;  %v330_v17 = vld [vmem:[%s1573_s2] sm:$0xff] (!%p251_p7)  ;;  %v332_v19 = vld [vmem:[%s1573_s2 + $0x10] sm:$0xff] (!%p251_p7)  ;;  %vm642_vm0 = vcmask (!%p251_p7), 523264   ;;  %v331_v20 = vld [vmem:[%s1573_s2 + $0x8] sm:$0xff] (!%p251_p7)  ;;  %v995_v4 = vlaneseq (!%p251_p7) }
  0x1c   : > { %254 = sbr.rel (%p251_p7) target bundleno = 641 (0x281), region = 74  ;;  %s1155_s10 = sshll.u32 (!%p251_p7), %s257_s9, 6  ;;  %723 = vmatprep.mubr.bf16.mxu0 (!%p251_p7), %v1292_v8  ;;  %1230 = vset.pattern.permute.xlu0 (!%p251_p7), %v1292_v8  ;;  %v1244_v18 = vld [vmem:[%s1572_s1] sm:$0xff] (!%p251_p7)   ;;  %v333_v21 = vld [vmem:[%s1573_s2 + $0x18] sm:$0xff] (!%p251_p7)  ;;  %v335_v23 = vld [vmem:[%s1573_s2 + $0x28] sm:$0xff] (!%p251_p7)  ;;  %vm1081_vm1 = vcmask (!%p251_p7), 1040384  }
  0x1d   : > { %1231 = vset.pattern.permute.xlu1 (!%p251_p7), %v1292_v8  ;;  %s259_s11 = scalar_lea.vmem (!%p251_p7), [#allocation3], %s1155_s10  ;;  %364 = vperm.xlu0 (!%p251_p7), %1230, %v330_v17   ;;  %v334_v22 = vld [vmem:[%s1573_s2 + $0x20] sm:$0xff] (!%p251_p7)  ;;  %v1245_v24 = vld [vmem:[%s1572_s1 + $0x8] sm:$0xff] (!%p251_p7)   ;;  %v336_v25 = vld [vmem:[%s1573_s2 + $0x30] sm:$0xff] (!%p251_p7)  ;;  %v1293_v2 = vmov (!%p251_p7), 1966171168  }
  0x1e   : > { %v1232_v9 = vld [vmem:[%s259_s11 + $0x4] ss:$8 sps:$4 sm:$0xff] (!%p251_p7)   ;;  %v1234_v10 = vld [vmem:[%s259_s11] ss:$8 sps:$4 sm:$0xff] (!%p251_p7)   ;;  %v1235_v11 = vld [vmem:[%s259_s11 + $0x14] ss:$8 sps:$4 sm:$0xff] (!%p251_p7)   ;;  %374 = vperm.xlu1 (!%p251_p7), %1231, %v332_v19   ;;  %v993_v3 = vunpack.c.l.s4 (!%p251_p7), %v1293_v2 }
  0x1f   : > { %691 = vmatprep.subr.bf16.mxu0 (!%p251_p7), %v1232_v9  ;;  %v1237_v12 = vld [vmem:[%s259_s11 + $0x10] ss:$8 sps:$4 sm:$0xff] (!%p251_p7)   ;;  %v1238_v13 = vld [vmem:[%s259_s11 + $0x24] ss:$8 sps:$4 sm:$0xff] (!%p251_p7)   ;;  %v1240_v14 = vld [vmem:[%s259_s11 + $0x20] ss:$8 sps:$4 sm:$0xff] (!%p251_p7)  }
  0x20   : > { %692 = vmatpush1.bf16.msra.mxu0 (!%p251_p7), %v1234_v10  ;;  %v1241_v15 = vld [vmem:[%s259_s11 + $0x34] ss:$8 sps:$4 sm:$0xff] (!%p251_p7)   ;;  %v1243_v16 = vld [vmem:[%s259_s11 + $0x30] ss:$8 sps:$4 sm:$0xff] (!%p251_p7)   ;;  %v338_v27 = vld [vmem:[%s1573_s2 + $0x40] sm:$0xff] (!%p251_p7)  ;;  %v994_v5 = vunpack.c.0.s8 (!%p251_p7), %v993_v3  ;;  %v996_v6 = vshrl.u32 (!%p251_p7), %v995_v4, 7 }
  0x21   : > { %693 = vmatprep.subr.bf16.mxu0 (!%p251_p7), %v1235_v11  ;;  %369 = vperm.xlu0 (!%p251_p7), %1230, %v331_v20   ;;  %v337_v26 = vld [vmem:[%s1573_s2 + $0x38] sm:$0xff] (!%p251_p7)  ;;  %v339_v28 = vld [vmem:[%s1573_s2 + $0x48] sm:$0xff] (!%p251_p7)  ;;  %v1246_v29 = vld [vmem:[%s1572_s1 + $0x10] sm:$0xff] (!%p251_p7)   ;;  %s981_s30 = sld [smem:[#allocation2]] (!%p251_p7)  ;;  %s1156_s6 = sshll.u32 (!%p251_p7), %s1147_s4, 1  ;;  %vm1084_vm3 = vcmask (!%p251_p7), 1041409  }
  0x22   : > { %379 = vperm.xlu1 (!%p251_p7), %1231, %v333_v21   ;;  %v340_v30 = vld [vmem:[%s1573_s2 + $0x50] sm:$0xff] (!%p251_p7)  ;;  %v341_v31 = vld [vmem:[%s1573_s2 + $0x58] sm:$0xff] (!%p251_p7)  ;;  %v342_v32 = vld [vmem:[%s1573_s2 + $0x60] sm:$0xff] (!%p251_p7)  ;;  %p285_p8 = scmp.lt.s32.totalorder (!%p251_p7), %s1156_s6, 3  ;;  %vm1082_vm2 = vsmask.f32 (!%p251_p7), 256 }
  0x23   : > { %v343_v33 = vld [vmem:[%s1573_s2 + $0x68] sm:$0xff]  ;;  %v1247_v34 = vld [vmem:[%s1572_s1 + $0x18] sm:$0xff]   ;;  %v344_v35 = vld [vmem:[%s1573_s2 + $0x70] sm:$0xff]  ;;  %vm1085_vm4 = vsmask.f32 1280 }
  0x24   : > { %694 = vmatpush1.bf16.msra.mxu0 %v1237_v12  ;;  %v345_v36 = vld [vmem:[%s1573_s2 + $0x78] sm:$0xff]  ;;  %v346_v37 = vld [vmem:[%s1573_s2 + $0x80] sm:$0xff]  ;;  %v347_v38 = vld [vmem:[%s1573_s2 + $0x88] sm:$0xff]  ;;  %s1581_s6 = smov (!%p285_p8, %s1156_s6), 3 }
  0x25   : > { %695 = vmatprep.subr.bf16.mxu0 %v1238_v13  ;;  %384 = vperm.xlu0 %1230, %v334_v22   ;;  %v1248_v39 = vld [vmem:[%s1572_s1 + $0x20] sm:$0xff]   ;;  %v348_v40 = vld [vmem:[%s1573_s2 + $0x90] sm:$0xff]  ;;  %v349_v41 = vld [vmem:[%s1573_s2 + $0x98] sm:$0xff]  ;;  %v1549_v13 = vsub.s32 %v994_v5, %v996_v6  ;;  %s287_s9 = scalar_lea.vmem %s1576_s5, %s1581_s6 }
  0x26   : > { %389 = vperm.xlu1 %1231, %v335_v23   ;;  %v350_v42 = vld [vmem:[%s1573_s2 + $0xa0] sm:$0xff]  ;;  %v351_v43 = vld [vmem:[%s1573_s2 + $0xa8] sm:$0xff]  ;;  %v352_v45 = vld [vmem:[%s1573_s2 + $0xb0] sm:$0xff] }
  0x27   : > { %v1249_v44 = vld [vmem:[%s1572_s1 + $0x28] sm:$0xff]   ;;  %v353_v46 = vld [vmem:[%s1573_s2 + $0xb8] sm:$0xff]  ;;  %v354_v47 = vld [vmem:[%s1573_s2 + $0xc0] sm:$0xff] }
  0x28   : > { %696 = vmatpush1.bf16.msra.mxu0 %v1240_v14  ;;  %v355_v48 = vld [vmem:[%s1573_s2 + $0xc8] sm:$0xff]  ;;  %v1250_v49 = vld [vmem:[%s1572_s1 + $0x30] sm:$0xff]   ;;  %v357_v51 = vld [vmem:[%s1573_s2 + $0xd8] sm:$0xff] }
  0x29   : > { %697 = vmatprep.subr.bf16.mxu0 %v1241_v15  ;;  %394 = vperm.xlu0 %1230, %v336_v25   ;;  %v356_v50 = vld [vmem:[%s1573_s2 + $0xd0] sm:$0xff]  ;;  %v358_v52 = vld [vmem:[%s1573_s2 + $0xe0] sm:$0xff]  ;;  %v359_v53 = vld [vmem:[%s1573_s2 + $0xe8] sm:$0xff] }
  0x2a   : > { %399 = vperm.xlu1 %1231, %v337_v26   ;;  %v1251_v54 = vld [vmem:[%s1572_s1 + $0x38] sm:$0xff]   ;;  %v360_v55 = vld [vmem:[%s1573_s2 + $0xf0] sm:$0xff]  ;;  %v1252_v57 = vld [vmem:[%s1572_s1 + $0x40] sm:$0xff]  }
  0x2b   : > { %v361_v56 = vld [vmem:[%s1573_s2 + $0xf8] sm:$0xff]  ;;  %v1253_v58 = vld [vmem:[%s1572_s1 + $0x48] sm:$0xff]   ;;  %v1254_v59 = vld [vmem:[%s1572_s1 + $0x50] sm:$0xff]  }
  0x2c   : > { %698 = vmatpush1.bf16.msra.mxu0 %v1243_v16  ;;  %v1255_v60 = vld [vmem:[%s1572_s1 + $0x58] sm:$0xff]   ;;  %v1256_v61 = vld [vmem:[%s1572_s1 + $0x60] sm:$0xff]   ;;  %v1257_v62 = vld [vmem:[%s1572_s1 + $0x68] sm:$0xff]  }
  0x2d   : > { %404 = vperm.xlu0 %1230, %v338_v27   ;;  %v1258_v63 = vld [vmem:[%s1572_s1 + $0x70] sm:$0xff]   ;;  %v1259_v0 = vld [vmem:[%s1572_s1 + $0x78] sm:$0xff]   ;;  %v1545_v10 = vld.sshfl [vmem:[%s1574_s3] sm:$0x11 pattern:$0x75316420] }
  0x2e   : > { %409 = vperm.xlu1 %1231, %v339_v28   ;;  %v991_v12 = vcombine.high %v1545_v10, %v1545_v10  ;;  %vm1083_vm5 = vmand %vm1081_vm1, %vm1082_vm2 }
  0x2f   : > { %1181 = vmatmul.mubr.msk.bf16.vlgmr.msra.gmra.mrb[0].mxu0 %vm642_vm0, %v1244_v18  ;;  %vm1086_vm6 = vmand %vm1084_vm3, %vm1085_vm4 }
  0x30   : > { %733 = vmatprep.mubr.bf16.mxu0 %v1292_v8  ;;  %v1005_v18 = vrot.slane %v991_v12, %v1549_v13  ;;  %vm1087_vm7 = vmor %vm1086_vm6, %vm1083_vm5 }
  0x31   : > { %414 = vperm.xlu0 %1230, %v340_v30  }
  0x32   : > { %419 = vperm.xlu1 %1231, %v341_v31   ;;  %1040 = vmatprep.mubr.bf16.mxu1 %v1005_v18 }
  0x35   : > { %424 = vperm.xlu0 %1230, %v342_v32  }
  0x36   : > { %429 = vperm.xlu1 %1231, %v343_v33  }
  0x37   : > { %1182 = vmatmul.mubr.msk.bf16.gmra.mrb[4].mxu0 %vm642_vm0, %v1245_v24 }
  0x38   : > { %743 = vmatprep.mubr.bf16.mxu0 %v1292_v8 }
  0x39   : > { %434 = vperm.xlu0 %1230, %v344_v35  }
  0x3a   : > { %439 = vperm.xlu1 %1231, %v345_v36  }
  0x3d   : > { %444 = vperm.xlu0 %1230, %v346_v37  }
  0x3e   : > { %449 = vperm.xlu1 %1231, %v347_v38  }
  0x3f   : > { %1183 = vmatmul.mubr.msk.bf16.gmra.mrb[8].mxu0 %vm642_vm0, %v1246_v29 }
  0x40   : > { %753 = vmatprep.mubr.bf16.mxu0 %v1292_v8 }
  0x41   : > { %454 = vperm.xlu0 %1230, %v348_v40  }
  0x42   : > { %459 = vperm.xlu1 %1231, %v349_v41  }
  0x45   : > { %464 = vperm.xlu0 %1230, %v350_v42  }
  0x46   : > { %469 = vperm.xlu1 %1231, %v351_v43  }
  0x47   : > { %1184 = vmatmul.mubr.msk.bf16.gmra.mrb[12].mxu0 %vm642_vm0, %v1247_v34 }
  0x48   : > { %763 = vmatprep.mubr.bf16.mxu0 %v1292_v8 }
  0x49   : > { %474 = vperm.xlu0 %1230, %v352_v45  }
  0x4a   : > { %479 = vperm.xlu1 %1231, %v353_v46  }
  0x4d   : > { %484 = vperm.xlu0 %1230, %v354_v47  }
  0x4e   : > { %489 = vperm.xlu1 %1231, %v355_v48  }
  0x4f   : > { %1185 = vmatmul.mubr.msk.bf16.gmra.mrb[16].mxu0 %vm642_vm0, %v1248_v39 }
  0x50   : > { %773 = vmatprep.mubr.bf16.mxu0 %v1292_v8 }
  0x51   : > { %494 = vperm.xlu0 %1230, %v356_v50  }
  0x52   : > { %499 = vperm.xlu1 %1231, %v357_v51  }
  0x55   : > { %504 = vperm.xlu0 %1230, %v358_v52  }
  0x56   : > { %509 = vperm.xlu1 %1231, %v359_v53  }
  0x57   : > { %1186 = vmatmul.mubr.msk.bf16.gmra.mrb[20].mxu0 %vm642_vm0, %v1249_v44 }
  0x58   : > { %783 = vmatprep.mubr.bf16.mxu0 %v1292_v8 }
  0x59   : > { %514 = vperm.xlu0 %1230, %v360_v55  }
  0x5a   : > { %519 = vperm.xlu1 %1231, %v361_v56  }
  0x5f   : > { %1187 = vmatmul.mubr.msk.bf16.gmra.mrb[24].mxu0 %vm642_vm0, %v1250_v49 }
  0x60   : > { %793 = vmatprep.mubr.bf16.mxu0 %v1292_v8 }
  0x67   : > { %1188 = vmatmul.mubr.msk.bf16.gmra.mrb[28].mxu0 %vm642_vm0, %v1251_v54 }
  0x68   : > { %803 = vmatprep.mubr.bf16.mxu0 %v1292_v8 }
  0x6f   : > { %1189 = vmatmul.mubr.msk.bf16.gmra.mrb[32].mxu0 %vm642_vm0, %v1252_v57 }
  0x70   : > { %813 = vmatprep.mubr.bf16.mxu0 %v1292_v8 }
  0x77   : > { %1190 = vmatmul.mubr.msk.bf16.gmra.mrb[36].mxu0 %vm642_vm0, %v1253_v58 }
  0x78   : > { %823 = vmatprep.mubr.bf16.mxu0 %v1292_v8 }
  0x7f   : > { %1191 = vmatmul.mubr.msk.bf16.gmra.mrb[40].mxu0 %vm642_vm0, %v1254_v59 }
  0x80   : > { %833 = vmatprep.mubr.bf16.mxu0 %v1292_v8 }
  0x87   : > { %1192 = vmatmul.mubr.msk.bf16.gmra.mrb[44].mxu0 %vm642_vm0, %v1255_v60 }
  0x88   : > { %843 = vmatprep.mubr.bf16.mxu0 %v1292_v8 }
  0x8f   : > { %1193 = vmatmul.mubr.msk.bf16.gmra.mrb[48].mxu0 %vm642_vm0, %v1256_v61 }
  0x90   : > { %853 = vmatprep.mubr.bf16.mxu0 %v1292_v8 }
  0x97   : > { %1194 = vmatmul.mubr.msk.bf16.gmra.mrb[52].mxu0 %vm642_vm0, %v1257_v62 }
  0x98   : > { %863 = vmatprep.mubr.bf16.mxu0 %v1292_v8 }
  0x9c   : > { %v365_v1 = vpop.permute.xlu0 %364 }
  0x9d   : > { %v375_v19 = vpop.permute.xlu1 %374 }
  0x9f   : > { %1195 = vmatmul.mubr.msk.bf16.gmra.mrb[56].mxu0 %vm642_vm0, %v1258_v63 }
  0xa0   : > { %873 = vmatprep.mubr.bf16.mxu0 %v1292_v8  ;;  %v370_v9 = vpop.permute.xlu0 %369 }
  0xa1   : > { %v380_v30 = vpop.permute.xlu1 %379 }
  0xa4   : > { %v385_v41 = vpop.permute.xlu0 %384 }
  0xa5   : > { %v390_v46 = vpop.permute.xlu1 %389 }
  0xa7   : > { %1196 = vmatmul.mubr.msk.bf16.gmra.mrb[60].mxu0 %vm642_vm0, %v1259_v0 }
  0xa8   : > { %v395_v57 = vpop.permute.xlu0 %394 }
  0xa9   : > { %v400_v62 = vpop.permute.xlu1 %399 }
 0x102   : > { %v725_v7 = vpop.f32.mrb[0].mxu0 }
 0x103   : > { %v726_v8 = vadd.f32 %v725_v7, %v365_v1  ;;  %v727_v11 = vpop.f32.mrb[1].mxu0 }
 0x104   : > { %v728_v14 = vadd.f32 %v727_v11, %v365_v1  ;;  %v729_v15 = vpop.f32.mrb[2].mxu0 }
 0x105   : > { %v730_v16 = vadd.f32 %v729_v15, %v370_v9  ;;  %v731_v17 = vpop.f32.mrb[3].mxu0  ;;  %v884_v21 = vmax.f32 %v726_v8, 0.0  ;;  %v405_v8 = vpop.permute.xlu0 %404 }
 0x106   : > { %v732_v20 = vadd.f32 %v731_v17, %v370_v9  ;;  %v885_v23 = vmax.f32 %v728_v14, 0.0 }
 0x107   : > { %v886_v22 = vmax.f32 %v730_v16, 0.0  ;;  %v410_v16 = vpop.permute.xlu1 %409 }
 0x108   : > { %v887_v24 = vmax.f32 %v732_v20, 0.0 }
 0x109   : > { %v949_v25 = vpack.c.bf16 %v886_v22, %v884_v21 }
 0x10a   : > { %v735_v26 = vpop.f32.mrb[4].mxu0  ;;  %v950_v27 = vpack.c.bf16 %v887_v24, %v885_v23 }
 0x10b   : > { %v736_v28 = vadd.f32 %v735_v26, %v375_v19  ;;  %v737_v29 = vpop.f32.mrb[5].mxu0 }
 0x10c   : > { %v738_v31 = vadd.f32 %v737_v29, %v375_v19  ;;  %v739_v32 = vpop.f32.mrb[6].mxu0  ;;  %1008 = vmatprep.subr.bf16.mxu1 %v950_v27  ;;  %v415_v27 = vpop.permute.xlu0 %414 }
 0x10d   : > { %v740_v33 = vadd.f32 %v739_v32, %v380_v30  ;;  %v741_v34 = vpop.f32.mrb[7].mxu0  ;;  %1009 = vmatpush1.bf16.msra.mxu1 %v949_v25  ;;  %v888_v36 = vmax.f32 %v736_v28, 0.0  ;;  %v420_v32 = vpop.permute.xlu1 %419 }
 0x10e   : > { %v742_v35 = vadd.f32 %v741_v34, %v380_v30  ;;  %v889_v38 = vmax.f32 %v738_v31, 0.0 }
 0x10f   : > { %v890_v37 = vmax.f32 %v740_v33, 0.0 }
 0x110   : > { %v891_v39 = vmax.f32 %v742_v35, 0.0 }
 0x111   : > { %v951_v40 = vpack.c.bf16 %v890_v37, %v888_v36 }
 0x112   : > { %v952_v42 = vpack.c.bf16 %v891_v39, %v889_v38  ;;  %v745_v43 = vpop.f32.mrb[8].mxu0 }
 0x113   : > { %v746_v44 = vadd.f32 %v745_v43, %v385_v41  ;;  %v747_v45 = vpop.f32.mrb[9].mxu0  ;;  %v425_v43 = vpop.permute.xlu0 %424 }
 0x114   : > { %v748_v47 = vadd.f32 %v747_v45, %v385_v41  ;;  %v749_v48 = vpop.f32.mrb[10].mxu0  ;;  %1010 = vmatprep.subr.bf16.mxu1 %v952_v42 }
 0x115   : > { %v750_v49 = vadd.f32 %v749_v48, %v390_v46  ;;  %v751_v50 = vpop.f32.mrb[11].mxu0  ;;  %1011 = vmatpush1.bf16.msra.mxu1 %v951_v40  ;;  %v892_v52 = vmax.f32 %v746_v44, 0.0  ;;  %v430_v48 = vpop.permute.xlu1 %429 }
 0x116   : > { %v752_v51 = vadd.f32 %v751_v50, %v390_v46  ;;  %v893_v54 = vmax.f32 %v748_v47, 0.0 }
 0x117   : > { %v894_v53 = vmax.f32 %v750_v49, 0.0 }
 0x118   : > { %v895_v55 = vmax.f32 %v752_v51, 0.0 }
 0x119   : > { %v953_v56 = vpack.c.bf16 %v894_v53, %v892_v52 }
 0x11a   : > { %v954_v58 = vpack.c.bf16 %v895_v55, %v893_v54  ;;  %v755_v59 = vpop.f32.mrb[12].mxu0 }
 0x11b   : > { %v756_v60 = vadd.f32 %v755_v59, %v395_v57  ;;  %v757_v61 = vpop.f32.mrb[13].mxu0  ;;  %v435_v59 = vpop.permute.xlu0 %434 }
 0x11c   : > { %v758_v63 = vadd.f32 %v757_v61, %v395_v57  ;;  %v759_v0 = vpop.f32.mrb[14].mxu0  ;;  %1012 = vmatprep.subr.bf16.mxu1 %v954_v58 }
 0x11d   : > { %v760_v1 = vadd.f32 %v759_v0, %v400_v62  ;;  %v761_v2 = vpop.f32.mrb[15].mxu0  ;;  %1013 = vmatpush1.bf16.msra.mxu1 %v953_v56  ;;  %v896_v4 = vmax.f32 %v756_v60, 0.0  ;;  %v440_v0 = vpop.permute.xlu1 %439 }
 0x11e   : > { %v762_v3 = vadd.f32 %v761_v2, %v400_v62  ;;  %v897_v6 = vmax.f32 %v758_v63, 0.0 }
 0x11f   : > { %v898_v5 = vmax.f32 %v760_v1, 0.0 }
 0x120   : > { %v899_v7 = vmax.f32 %v762_v3, 0.0 }
 0x121   : > { %v955_v9 = vpack.c.bf16 %v898_v5, %v896_v4 }
 0x122   : > { %v956_v11 = vpack.c.bf16 %v899_v7, %v897_v6  ;;  %v765_v12 = vpop.f32.mrb[16].mxu0 }
 0x123   : > { %v766_v14 = vadd.f32 %v765_v12, %v405_v8  ;;  %v767_v15 = vpop.f32.mrb[17].mxu0  ;;  %v445_v12 = vpop.permute.xlu0 %444 }
 0x124   : > { %v768_v17 = vadd.f32 %v767_v15, %v405_v8  ;;  %v769_v18 = vpop.f32.mrb[18].mxu0  ;;  %1014 = vmatprep.subr.bf16.mxu1 %v956_v11 }
 0x125   : > { %v770_v19 = vadd.f32 %v769_v18, %v410_v16  ;;  %v771_v20 = vpop.f32.mrb[19].mxu0  ;;  %1015 = vmatpush1.bf16.msra.mxu1 %v955_v9  ;;  %v900_v22 = vmax.f32 %v766_v14, 0.0  ;;  %v450_v18 = vpop.permute.xlu1 %449 }
 0x126   : > { %v772_v21 = vadd.f32 %v771_v20, %v410_v16  ;;  %v901_v24 = vmax.f32 %v768_v17, 0.0 }
 0x127   : > { %v902_v23 = vmax.f32 %v770_v19, 0.0 }
 0x128   : > { %v903_v25 = vmax.f32 %v772_v21, 0.0 }
 0x129   : > { %v957_v26 = vpack.c.bf16 %v902_v23, %v900_v22 }
 0x12a   : > { %v958_v28 = vpack.c.bf16 %v903_v25, %v901_v24  ;;  %v775_v29 = vpop.f32.mrb[20].mxu0 }
 0x12b   : > { %v776_v30 = vadd.f32 %v775_v29, %v415_v27  ;;  %v777_v31 = vpop.f32.mrb[21].mxu0  ;;  %v455_v29 = vpop.permute.xlu0 %454 }
 0x12c   : > { %v778_v33 = vadd.f32 %v777_v31, %v415_v27  ;;  %v779_v34 = vpop.f32.mrb[22].mxu0  ;;  %1016 = vmatprep.subr.bf16.mxu1 %v958_v28 }
 0x12d   : > { %v780_v35 = vadd.f32 %v779_v34, %v420_v32  ;;  %v781_v36 = vpop.f32.mrb[23].mxu0  ;;  %1017 = vmatpush1.bf16.msra.mxu1 %v957_v26  ;;  %v904_v38 = vmax.f32 %v776_v30, 0.0  ;;  %v460_v34 = vpop.permute.xlu1 %459 }
 0x12e   : > { %v782_v37 = vadd.f32 %v781_v36, %v420_v32  ;;  %v905_v40 = vmax.f32 %v778_v33, 0.0 }
 0x12f   : > { %v906_v39 = vmax.f32 %v780_v35, 0.0 }
 0x130   : > { %v907_v41 = vmax.f32 %v782_v37, 0.0 }
 0x131   : > { %v959_v42 = vpack.c.bf16 %v906_v39, %v904_v38 }
 0x132   : > { %v960_v44 = vpack.c.bf16 %v907_v41, %v905_v40  ;;  %v785_v45 = vpop.f32.mrb[24].mxu0 }
 0x133   : > { %v786_v46 = vadd.f32 %v785_v45, %v425_v43  ;;  %v787_v47 = vpop.f32.mrb[25].mxu0  ;;  %v465_v45 = vpop.permute.xlu0 %464 }
 0x134   : > { %v788_v49 = vadd.f32 %v787_v47, %v425_v43  ;;  %v789_v50 = vpop.f32.mrb[26].mxu0  ;;  %1018 = vmatprep.subr.bf16.mxu1 %v960_v44 }
 0x135   : > { %v790_v51 = vadd.f32 %v789_v50, %v430_v48  ;;  %v791_v52 = vpop.f32.mrb[27].mxu0  ;;  %1019 = vmatpush1.bf16.msra.mxu1 %v959_v42  ;;  %v908_v54 = vmax.f32 %v786_v46, 0.0  ;;  %v470_v50 = vpop.permute.xlu1 %469 }
 0x136   : > { %v792_v53 = vadd.f32 %v791_v52, %v430_v48  ;;  %v909_v56 = vmax.f32 %v788_v49, 0.0 }
 0x137   : > { %v910_v55 = vmax.f32 %v790_v51, 0.0 }
 0x138   : > { %v911_v57 = vmax.f32 %v792_v53, 0.0 }
 0x139   : > { %v961_v58 = vpack.c.bf16 %v910_v55, %v908_v54 }
 0x13a   : > { %v962_v60 = vpack.c.bf16 %v911_v57, %v909_v56  ;;  %v795_v61 = vpop.f32.mrb[28].mxu0 }
 0x13b   : > { %v796_v62 = vadd.f32 %v795_v61, %v435_v59  ;;  %v797_v63 = vpop.f32.mrb[29].mxu0  ;;  %v475_v61 = vpop.permute.xlu0 %474 }
 0x13c   : > { %v798_v1 = vadd.f32 %v797_v63, %v435_v59  ;;  %v799_v2 = vpop.f32.mrb[30].mxu0  ;;  %1020 = vmatprep.subr.bf16.mxu1 %v962_v60 }
 0x13d   : > { %v800_v3 = vadd.f32 %v799_v2, %v440_v0  ;;  %v801_v4 = vpop.f32.mrb[31].mxu0  ;;  %1021 = vmatpush1.bf16.msra.mxu1 %v961_v58  ;;  %v912_v6 = vmax.f32 %v796_v62, 0.0  ;;  %v480_v2 = vpop.permute.xlu1 %479 }
 0x13e   : > { %v802_v5 = vadd.f32 %v801_v4, %v440_v0  ;;  %v913_v9 = vmax.f32 %v798_v1, 0.0 }
 0x13f   : > { %v914_v7 = vmax.f32 %v800_v3, 0.0 }
 0x140   : > { %v915_v8 = vmax.f32 %v802_v5, 0.0 }
 0x141   : > { %v963_v11 = vpack.c.bf16 %v914_v7, %v912_v6 }
 0x142   : > { %v964_v14 = vpack.c.bf16 %v915_v8, %v913_v9  ;;  %v805_v15 = vpop.f32.mrb[32].mxu0 }
 0x143   : > { %v806_v16 = vadd.f32 %v805_v15, %v445_v12  ;;  %v807_v17 = vpop.f32.mrb[33].mxu0  ;;  %v485_v15 = vpop.permute.xlu0 %484 }
 0x144   : > { %v808_v19 = vadd.f32 %v807_v17, %v445_v12  ;;  %v809_v20 = vpop.f32.mrb[34].mxu0  ;;  %1022 = vmatprep.subr.bf16.mxu1 %v964_v14 }
 0x145   : > { %v810_v21 = vadd.f32 %v809_v20, %v450_v18  ;;  %v811_v22 = vpop.f32.mrb[35].mxu0  ;;  %1023 = vmatpush1.bf16.msra.mxu1 %v963_v11  ;;  %v916_v24 = vmax.f32 %v806_v16, 0.0  ;;  %v490_v20 = vpop.permute.xlu1 %489 }
 0x146   : > { %v812_v23 = vadd.f32 %v811_v22, %v450_v18  ;;  %v917_v26 = vmax.f32 %v808_v19, 0.0 }
 0x147   : > { %v918_v25 = vmax.f32 %v810_v21, 0.0 }
 0x148   : > { %v919_v27 = vmax.f32 %v812_v23, 0.0 }
 0x149   : > { %v965_v28 = vpack.c.bf16 %v918_v25, %v916_v24 }
 0x14a   : > { %v966_v30 = vpack.c.bf16 %v919_v27, %v917_v26  ;;  %v815_v31 = vpop.f32.mrb[36].mxu0 }
 0x14b   : > { %v816_v32 = vadd.f32 %v815_v31, %v455_v29  ;;  %v817_v33 = vpop.f32.mrb[37].mxu0  ;;  %v495_v31 = vpop.permute.xlu0 %494 }
 0x14c   : > { %v818_v35 = vadd.f32 %v817_v33, %v455_v29  ;;  %v819_v36 = vpop.f32.mrb[38].mxu0  ;;  %1024 = vmatprep.subr.bf16.mxu1 %v966_v30 }
 0x14d   : > { %v820_v37 = vadd.f32 %v819_v36, %v460_v34  ;;  %v821_v38 = vpop.f32.mrb[39].mxu0  ;;  %1025 = vmatpush1.bf16.msra.mxu1 %v965_v28  ;;  %v920_v40 = vmax.f32 %v816_v32, 0.0  ;;  %v500_v36 = vpop.permute.xlu1 %499 }
 0x14e   : > { %v822_v39 = vadd.f32 %v821_v38, %v460_v34  ;;  %v921_v42 = vmax.f32 %v818_v35, 0.0 }
 0x14f   : > { %v922_v41 = vmax.f32 %v820_v37, 0.0 }
 0x150   : > { %v923_v43 = vmax.f32 %v822_v39, 0.0 }
 0x151   : > { %v967_v44 = vpack.c.bf16 %v922_v41, %v920_v40 }
 0x152   : > { %v968_v46 = vpack.c.bf16 %v923_v43, %v921_v42  ;;  %v825_v47 = vpop.f32.mrb[40].mxu0 }
 0x153   : > { %v826_v48 = vadd.f32 %v825_v47, %v465_v45  ;;  %v827_v49 = vpop.f32.mrb[41].mxu0  ;;  %v505_v47 = vpop.permute.xlu0 %504 }
 0x154   : > { %v828_v51 = vadd.f32 %v827_v49, %v465_v45  ;;  %v829_v52 = vpop.f32.mrb[42].mxu0  ;;  %1026 = vmatprep.subr.bf16.mxu1 %v968_v46 }
 0x155   : > { %v830_v53 = vadd.f32 %v829_v52, %v470_v50  ;;  %v831_v54 = vpop.f32.mrb[43].mxu0  ;;  %1027 = vmatpush1.bf16.msra.mxu1 %v967_v44  ;;  %v924_v56 = vmax.f32 %v826_v48, 0.0  ;;  %v510_v52 = vpop.permute.xlu1 %509 }
 0x156   : > { %v832_v55 = vadd.f32 %v831_v54, %v470_v50  ;;  %v925_v58 = vmax.f32 %v828_v51, 0.0 }
 0x157   : > { %v926_v57 = vmax.f32 %v830_v53, 0.0 }
 0x158   : > { %v927_v59 = vmax.f32 %v832_v55, 0.0 }
 0x159   : > { %v969_v60 = vpack.c.bf16 %v926_v57, %v924_v56 }
 0x15a   : > { %v970_v62 = vpack.c.bf16 %v927_v59, %v925_v58  ;;  %v835_v63 = vpop.f32.mrb[44].mxu0 }
 0x15b   : > { %v836_v0 = vadd.f32 %v835_v63, %v475_v61  ;;  %v837_v1 = vpop.f32.mrb[45].mxu0  ;;  %v515_v63 = vpop.permute.xlu0 %514 }
 0x15c   : > { %v838_v3 = vadd.f32 %v837_v1, %v475_v61  ;;  %v839_v4 = vpop.f32.mrb[46].mxu0  ;;  %1028 = vmatprep.subr.bf16.mxu1 %v970_v62 }
 0x15d   : > { %v840_v5 = vadd.f32 %v839_v4, %v480_v2  ;;  %v841_v6 = vpop.f32.mrb[47].mxu0  ;;  %1029 = vmatpush1.bf16.msra.mxu1 %v969_v60  ;;  %v928_v9 = vmax.f32 %v836_v0, 0.0  ;;  %v520_v4 = vpop.permute.xlu1 %519 }
 0x15e   : > { %v842_v7 = vadd.f32 %v841_v6, %v480_v2  ;;  %v929_v11 = vmax.f32 %v838_v3, 0.0 }
 0x15f   : > { %v930_v8 = vmax.f32 %v840_v5, 0.0 }
 0x160   : > { %v931_v12 = vmax.f32 %v842_v7, 0.0 }
 0x161   : > { %v971_v14 = vpack.c.bf16 %v930_v8, %v928_v9 }
 0x162   : > { %v972_v16 = vpack.c.bf16 %v931_v12, %v929_v11  ;;  %v845_v17 = vpop.f32.mrb[48].mxu0 }
 0x163   : > { %v846_v18 = vadd.f32 %v845_v17, %v485_v15  ;;  %v847_v19 = vpop.f32.mrb[49].mxu0 }
 0x164   : > { %v848_v21 = vadd.f32 %v847_v19, %v485_v15  ;;  %v849_v22 = vpop.f32.mrb[50].mxu0  ;;  %1030 = vmatprep.subr.bf16.mxu1 %v972_v16  ;;  %v982_v19 = vstv %s981_s30 }
 0x165   : > { %v850_v23 = vadd.f32 %v849_v22, %v490_v20  ;;  %v851_v24 = vpop.f32.mrb[51].mxu0  ;;  %1031 = vmatpush1.bf16.msra.mxu1 %v971_v14  ;;  %v932_v26 = vmax.f32 %v846_v18, 0.0  ;;  %v998_v18 = vrot.slane %v1545_v10, %v1549_v13 }
 0x166   : > { %v852_v25 = vadd.f32 %v851_v24, %v490_v20  ;;  %v933_v28 = vmax.f32 %v848_v21, 0.0 }
 0x167   : > { %v934_v27 = vmax.f32 %v850_v23, 0.0 }
 0x168   : > { %v935_v29 = vmax.f32 %v852_v25, 0.0 }
 0x169   : > { %v973_v30 = vpack.c.bf16 %v934_v27, %v932_v26 }
 0x16a   : > { %v974_v32 = vpack.c.bf16 %v935_v29, %v933_v28  ;;  %v855_v33 = vpop.f32.mrb[52].mxu0 }
 0x16b   : > { %v856_v34 = vadd.f32 %v855_v33, %v495_v31  ;;  %v857_v35 = vpop.f32.mrb[53].mxu0 }
 0x16c   : > { %v858_v37 = vadd.f32 %v857_v35, %v495_v31  ;;  %v859_v38 = vpop.f32.mrb[54].mxu0  ;;  %1032 = vmatprep.subr.bf16.mxu1 %v974_v32  ;;  %v1088_v35 = vld [vmem:[%s287_s9] sm:$0x3] }
 0x16d   : > { %v860_v39 = vadd.f32 %v859_v38, %v500_v36  ;;  %v861_v40 = vpop.f32.mrb[55].mxu0  ;;  %1033 = vmatpush1.bf16.msra.mxu1 %v973_v30  ;;  %v936_v42 = vmax.f32 %v856_v34, 0.0 }
 0x16e   : > { %v862_v41 = vadd.f32 %v861_v40, %v500_v36  ;;  %v937_v44 = vmax.f32 %v858_v37, 0.0 }
 0x16f   : > { %v938_v43 = vmax.f32 %v860_v39, 0.0 }
 0x170   : > { %v939_v45 = vmax.f32 %v862_v41, 0.0 }
 0x171   : > { %v975_v46 = vpack.c.bf16 %v938_v43, %v936_v42 }
 0x172   : > { %v976_v48 = vpack.c.bf16 %v939_v45, %v937_v44  ;;  %v865_v49 = vpop.f32.mrb[56].mxu0 }
 0x173   : > { %v866_v50 = vadd.f32 %v865_v49, %v505_v47  ;;  %v867_v51 = vpop.f32.mrb[57].mxu0 }
 0x174   : > { %v868_v53 = vadd.f32 %v867_v51, %v505_v47  ;;  %v869_v54 = vpop.f32.mrb[58].mxu0  ;;  %1034 = vmatprep.subr.bf16.mxu1 %v976_v48 }
 0x175   : > { %v870_v55 = vadd.f32 %v869_v54, %v510_v52  ;;  %v871_v56 = vpop.f32.mrb[59].mxu0  ;;  %1035 = vmatpush1.bf16.msra.mxu1 %v975_v46  ;;  %v940_v58 = vmax.f32 %v866_v50, 0.0 }
 0x176   : > { %v872_v57 = vadd.f32 %v871_v56, %v510_v52  ;;  %v941_v60 = vmax.f32 %v868_v53, 0.0 }
 0x177   : > { %v942_v59 = vmax.f32 %v870_v55, 0.0 }
 0x178   : > { %v943_v61 = vmax.f32 %v872_v57, 0.0 }
 0x179   : > { %v977_v62 = vpack.c.bf16 %v942_v59, %v940_v58 }
 0x17a   : > { %v978_v0 = vpack.c.bf16 %v943_v61, %v941_v60  ;;  %v875_v1 = vpop.f32.mrb[60].mxu0 }
 0x17b   : > { %v876_v2 = vadd.f32 %v875_v1, %v515_v63  ;;  %v877_v3 = vpop.f32.mrb[61].mxu0 }
 0x17c   : > { %v878_v5 = vadd.f32 %v877_v3, %v515_v63  ;;  %v879_v6 = vpop.f32.mrb[62].mxu0  ;;  %1036 = vmatprep.subr.bf16.mxu1 %v978_v0 }
 0x17d   : > { %v880_v7 = vadd.f32 %v879_v6, %v520_v4  ;;  %v881_v9 = vpop.f32.mrb[63].mxu0  ;;  %1037 = vmatpush1.bf16.msra.mxu1 %v977_v62  ;;  %v944_v11 = vmax.f32 %v876_v2, 0.0 }
 0x17e   : > { %v882_v8 = vadd.f32 %v881_v9, %v520_v4  ;;  %v945_v14 = vmax.f32 %v878_v5, 0.0 }
 0x17f   : > { %v946_v12 = vmax.f32 %v880_v7, 0.0 }
 0x180   : > { %v947_v15 = vmax.f32 %v882_v8, 0.0 }
 0x181   : > { %v979_v16 = vpack.c.bf16 %v946_v12, %v944_v11 }
 0x182   : > { %v980_v17 = vpack.c.bf16 %v947_v15, %v945_v14 }
 0x184   : > { %1038 = vmatprep.subr.bf16.mxu1 %v980_v17 }
 0x185   : > { %1039 = vmatpush1.bf16.msra.mxu1 %v979_v16 }
 0x188   : > { %1041 = vmatmul.mubr.bf16.vlgmr.msra.gmra.mrb[0].mxu1 %v998_v18 }
 0x25b   : > { %v1042_v20 = vpop.f32.mrb[0].mxu1 }
 0x25c   : > { %v1043_v21 = vadd.f32 %v1042_v20, %v982_v19  ;;  %v1044_v22 = vpop.f32.mrb[1].mxu1 }
 0x25d   : > { %v1045_v23 = vadd.f32 %v1044_v22, %v982_v19  ;;  %v1046_v24 = vpop.f32.mrb[2].mxu1 }
 0x25e   : > { %v1198_v25 = vmul.f32 -1.442695, %v1043_v21  ;;  %v1047_v26 = vpop.f32.mrb[3].mxu1 }
 0x25f   : > { %v1199_v27 = vmul.f32 -1.442695, %v1045_v23 }
 0x260   : > { %1260 = vpow2.f32 %v1198_v25 }
 0x261   : > { %1262 = vpow2.f32 %v1199_v27 }
 0x26a   : > { %v1261_v28 = vpop.eup %1260 }
 0x26b   : > { %v1263_v29 = vpop.eup %1262  ;;  %v1055_v30 = vadd.f32 1.0, %v1261_v28 }
 0x26c   : > { %v1056_v31 = vadd.f32 1.0, %v1263_v29 }
 0x26d   : > { %1264 = vrcp.f32 %v1055_v30 }
 0x26e   : > { %1266 = vrcp.f32 %v1056_v31 }
 0x277   : > { %v1265_v10 = vpop.eup %1264 }
 0x278   : > { %v1267_v32 = vpop.eup %1266 }
 0x279   : > { %v1200_v33 = vpack.c.bf16 %v1267_v32, %v1265_v10 }
 0x27b   : > { %v1072_v34 = vrot.slane %v1200_v33, %v1549_v13 }
 0x27d   : > { %v1079_v36 = vrot.slane %v1072_v34, %v1549_v13 }
 0x27f   : > { %v1089_v37 = vsel %vm1087_vm7, %v1079_v36, %v1088_v35 }
 0x280   : > { %1090 = vst [vmem:[%s287_s9] sm:$0x3] %v1089_v37 }
 0x281 PF: > { %p13_p9 = scmp.ge.s32.totalorder %s1344_s23, 4   ;;  %s1577_s20 = smov %s1286_s21 }
 0x282   : > { %s1578_s21 = smov %s1353_s26  ;;  %s1579_s22 = smov %s1344_s23 }
 0x283   :  { %15 = sbr.rel (!%p13_p9) target bundleno = 4 (0x4), region = 113 }

</bundles_post_ra>
